<compile_context>
chip_gen: v7x
topology: tpu7x:2x2x1
jax: 0.10.0
libtpu: 0.0.40
codegen_flags: <defaults>
</compile_context>

<pallas_src>
import functools
import math

import numpy as np
import jax
import jax.numpy as jnp
from jax.experimental import pallas as pl
from jax.experimental.pallas import tpu as pltpu


# ----------------------------------------------------------------------------
# Host-side constant matrices
# ----------------------------------------------------------------------------
def _dft_mats(n):
    """Ortho-normalised DFT cos/sin matrices with fftshift baked into the rows."""
    idx = np.arange(n)
    freq = (idx - n // 2) % n                        # fftshift of output rows
    ang = 2.0 * np.pi * np.outer(freq, idx) / n
    c = (np.cos(ang) / np.sqrt(n)).astype(np.float32)
    s = (np.sin(ang) / np.sqrt(n)).astype(np.float32)
    # complex DFT row matrix is (c - i*s); 1/sqrt(n) gives norm='ortho'
    return c, s


def _pool_matrix(in_size, out_size):
    """Per-axis matrix reproducing torch.nn.AdaptiveAvgPool2d exactly."""
    P = np.zeros((out_size, in_size), np.float32)
    for i in range(out_size):
        s = (i * in_size) // out_size
        e = -(-((i + 1) * in_size) // out_size)      # ceil
        P[i, s:e] = 1.0 / (e - s)
    return P


def _pass_mask(H, W, pass_manner, passband):
    """Band mask on the fftshifted spectrum (Python/torch negative-slice semantics).

    The reference masks the spectra *before* the focal-weight computation, so the
    weight-matrix normalisation constant is taken from masked diffs — the kernel
    applies the mask to d before computing w/w_max, matching that order.
    """
    hc, wc = H // 2, W // 2
    if pass_manner == 'high':
        m = np.ones((H, W), np.float32)
        m[hc - passband:hc + passband, wc - passband:wc + passband] = 0.0
    elif pass_manner == 'low':
        m = np.zeros((H, W), np.float32)
        m[hc - passband:hc + passband, wc - passband:wc + passband] = 1.0
    else:
        m = np.ones((H, W), np.float32)
    return m


# ----------------------------------------------------------------------------
# In-kernel helpers (traced inline)
# ----------------------------------------------------------------------------
def _spectrum_t(x, cs_w, cs_h, B, h_in, Hs, Ws):
    """Transposed shifted ortho-DFT spectra of a block of B images.

    x:    (B*h_in, w_in)  input block (bf16/f32; matmuls accumulate in f32)
    cs_w: (w_in, 2*Ws)    merged [C_W^T | S_W^T]
    cs_h: (h_in, 2*Hs)    merged [C_H^T | S_H^T]
    Returns re_t, im_t of shape (B, Ws, Hs) with re_t[b, w, h] == Re(F(x_b))[h, w].
    """
    f32 = jnp.float32
    ab = jnp.dot(x, cs_w, preferred_element_type=f32)              # (B*h_in, 2*Ws)
    # single corner turn carries BOTH cos and sin components
    ab_t = jnp.swapaxes(ab.reshape(B, h_in, 2 * Ws), 1, 2)         # (B, 2*Ws, h_in)
    ab_t = ab_t.reshape(B * 2 * Ws, h_in).astype(cs_h.dtype)
    y = jnp.dot(ab_t, cs_h, preferred_element_type=f32)            # (B*2*Ws, 2*Hs)
    y = y.reshape(B, 2 * Ws, 2 * Hs)
    aC = y[:, :Ws, :Hs]                                            # (C_H x C_W^T)^T
    aS = y[:, :Ws, Hs:]                                            # (S_H x C_W^T)^T
    bC = y[:, Ws:, :Hs]                                            # (C_H x S_W^T)^T
    bS = y[:, Ws:, Hs:]                                            # (S_H x S_W^T)^T
    re_t = aC - bS
    im_t = -(aS + bC)
    return re_t, im_t


def _focal_reduce(d, alpha, log_matrix):
    """Focal weighting + reduction on masked freq_distance d of shape (B, Ws, Hs)."""
    f32 = jnp.float32
    if alpha == 2.0:
        w = d                                        # sqrt(d)**2 == d
    elif alpha == 1.0:
        w = jnp.sqrt(d)
    else:
        w = jnp.sqrt(d) ** alpha
    if log_matrix:
        w = jnp.log(w + 1.0)
    # per-(n,c) max normalisation (batch_matrix=False path of the reference)
    w_max = jnp.max(jnp.max(w, axis=2, keepdims=True), axis=1, keepdims=True)
    inv = 1.0 / jnp.maximum(w_max, f32(1e-30))       # exact; guards all-zero / padded images
    w = w * inv
    w = jnp.where(jnp.isnan(w), f32(0.0), w)         # torch NaN guard
    w = jnp.clip(w, 0.0, 1.0)
    return jnp.sum(w * d)


# ----------------------------------------------------------------------------
# Fused kernels
# ----------------------------------------------------------------------------
def _ffl_diff_kernel(pred_ref, tgt_ref, cs_w_ref, cs_h_ref, mask_ref, out_ref, *,
                     B, H_in, Hs, Ws, alpha, log_matrix):
    """Normal path: pred and target share the DFT, so transform (pred - target) once."""
    diff = pred_ref[...] - tgt_ref[...]
    dr, di = _spectrum_t(diff, cs_w_ref[...], cs_h_ref[...], B, H_in, Hs, Ws)
    d = (dr * dr + di * di) * mask_ref[...]          # 0/1 mask applied once to d
    partial = _focal_reduce(d, alpha, log_matrix)
    out_ref[...] = jnp.broadcast_to(partial, out_ref.shape).astype(jnp.float32)


def _ffl_two_spec_kernel(pred_ref, tgt_ref, cs_wp_ref, cs_hp_ref,
                         cs_wt_ref, cs_ht_ref, mask_ref, out_ref, *,
                         B, Hp, Ht, Hs, Ws, alpha, log_matrix):
    """General path (high_level): target DFT has the adaptive-avg-pool folded in."""
    p_re, p_im = _spectrum_t(pred_ref[...], cs_wp_ref[...], cs_hp_ref[...], B, Hp, Hs, Ws)
    t_re, t_im = _spectrum_t(tgt_ref[...], cs_wt_ref[...], cs_ht_ref[...], B, Ht, Hs, Ws)
    dr = p_re - t_re
    di = p_im - t_im
    d = (dr * dr + di * di) * mask_ref[...]
    partial = _focal_reduce(d, alpha, log_matrix)
    out_ref[...] = jnp.broadcast_to(partial, out_ref.shape).astype(jnp.float32)


# ----------------------------------------------------------------------------
# Batching heuristic: images per grid step.
# ----------------------------------------------------------------------------
_VMEM_WORKSET_BUDGET = 8 * 1024 * 1024   # conservative: fits v5e's scoped VMEM too
_VMEM_LIMIT_BYTES = 32 * 1024 * 1024     # explicit scoped-VMEM limit (safe on v5e/v6e/v7x)


def _pick_block_batch(nc, h_pred, h_tgt, per_image_bytes, budget):
    """Images per grid step.

    Large B amortises the ~0.35us per-grid-step pipeline overhead; B is capped by a
    VMEM working-set budget (double-buffered input blocks + f32 temporaries) and by
    keeping at least two grid blocks (nudged even) so the 'parallel' grid axis can be
    split across the two v7x TensorCores.  The extra block costs one grid step on
    single-TC chips (v5e/v6e) — negligible.
    """
    def align(h):                                    # keep B*H a multiple of 8 (sublanes)
        return 8 // math.gcd(h, 8)

    a1, a2 = align(h_pred), align(h_tgt)
    step = (a1 * a2) // math.gcd(a1, a2)

    def round_up(v):
        return max(step, -(-v // step) * step)

    b_max = max(step, (budget // max(per_image_bytes, 1)) // step * step)   # VMEM cap
    bb = min(b_max, round_up(-(-nc // 2)), round_up(nc))                    # nblk >= 2
    nblk = -(-nc // bb)
    if nblk > 1 and nblk % 2 == 1:                   # prefer even block count (v7x balance)
        cand = round_up(-(-nc // (nblk + 1)))
        if cand <= b_max and (-(-nc // cand)) % 2 == 0:
            bb = cand
    return bb


# ----------------------------------------------------------------------------
# Public wrapper (matches FocalFrequencyLoss_2D_pooling.forward semantics)
# ----------------------------------------------------------------------------
def focal_frequency_loss_2d_pooling(pred, target, pass_manner, stage_manner,
                                    ave_spectrum, matrix=None, *,
                                    loss_weight=1.0, alpha=1.0, patch_factor=1,
                                    pass_band=20, log_matrix=False,
                                    batch_matrix=False,
                                    dft_dtype=jnp.bfloat16):
    assert matrix is None      # TODO(synk): external precomputed weight-matrix path not implemented
    assert not batch_matrix    # TODO(synk): batch_matrix=True needs a global (two-pass) max

    pred = pred.astype(jnp.float32)
    target = target.astype(jnp.float32)

    # ave_spectrum: pool / FFT / fftshift / band-mask are all linear, so averaging the
    # (small) inputs first is mathematically identical to averaging the masked spectra,
    # and keeps everything inside the single fused kernel.  (The reference's fftshift
    # over the N/C dims is a pure (n,c) relabelling applied identically to pred and
    # target, so it does not affect the loss and is not reproduced.)
    if ave_spectrum:
        pred = jnp.mean(pred, axis=0, keepdims=True)
        target = jnp.mean(target, axis=0, keepdims=True)

    N, C, Hp, Wp = pred.shape
    Nt, Ct, Ht, Wt = target.shape
    assert (N, C) == (Nt, Ct)

    # Shifted ortho DFT matrices; the AdaptiveAvgPool2d of the 'high_level' target path
    # is folded directly into the target DFT matrices.
    chp, shp = _dft_mats(Hp)
    cwp, swp = _dft_mats(Wp)
    Hs, Ws = Hp, Wp
    if stage_manner == 'high_level':
        oh = ow = int(128 / 4)
        ch_o, sh_o = _dft_mats(oh)
        cw_o, sw_o = _dft_mats(ow)
        ph = _pool_matrix(Ht, oh)
        pw = _pool_matrix(Wt, ow)
        cht, sht = ch_o @ ph, sh_o @ ph              # (32, Ht)
        cwt, swt = cw_o @ pw, sw_o @ pw              # (32, Wt)
        hs_t, ws_t = oh, ow
        same_transform = False
    else:
        cht, sht = _dft_mats(Ht)
        cwt, swt = _dft_mats(Wt)
        hs_t, ws_t = Ht, Wt
        same_transform = True                        # assert below forces (Hp,Wp)==(Ht,Wt)
    assert (Hs, Ws) == (hs_t, ws_t), \
        "pred spectrum and (pooled) target spectrum must have matching shapes"

    # Merged [cos | sin] matrices, transposed onto the matmul RHS.
    cs_w_pred = np.concatenate([cwp.T, swp.T], axis=1)          # (Wp, 2*Ws)
    cs_h_pred = np.concatenate([chp.T, shp.T], axis=1)          # (Hp, 2*Hs)
    cs_w_tgt = np.concatenate([cwt.T, swt.T], axis=1)           # (Wt, 2*Ws)
    cs_h_tgt = np.concatenate([cht.T, sht.T], axis=1)           # (Ht, 2*Hs)
    mask_t = np.ascontiguousarray(_pass_mask(Hs, Ws, pass_manner, pass_band).T)  # (Ws, Hs)

    # --- batching / zero-padding along the NC axis --------------------------
    NC = N * C
    dt_bytes = jnp.dtype(dft_dtype).itemsize
    in_bytes = dt_bytes * (Hp * Wp + Ht * Wt)                   # per image, per buffer
    spec_imgs = 1 if same_transform else 2
    tmp_bytes = (4 * spec_imgs * (4 * max(Hp, Ht) * Ws + 2 * (2 * Ws) * (2 * Hs))
                 + 4 * 8 * Ws * Hs)                             # f32 kernel temporaries
    per_image_bytes = 2 * in_bytes + tmp_bytes                  # inputs are double-buffered
    B = _pick_block_batch(NC, Hp, Ht, per_image_bytes, _VMEM_WORKSET_BUDGET)
    nblk = -(-NC // B)
    NCp = nblk * B

    pred2 = pred.reshape(NC, Hp, Wp)
    tgt2 = target.reshape(NC, Ht, Wt)
    if NCp != NC:
        pad = NCp - NC                               # zero images contribute exactly 0
        pred2 = jnp.pad(pred2, ((0, pad), (0, 0), (0, 0)))
        tgt2 = jnp.pad(tgt2, ((0, pad), (0, 0), (0, 0)))
    pred_flat = pred2.reshape(NCp * Hp, Wp).astype(dft_dtype)
    tgt_flat = tgt2.reshape(NCp * Ht, Wt).astype(dft_dtype)

    def mat(a):                                      # bf16 MXU operands, f32 accumulation
        return jnp.asarray(np.ascontiguousarray(a), dtype=dft_dtype)

    def const_spec(shape):
        return pl.BlockSpec(shape, lambda i: (0, 0))

    out_shape = jax.ShapeDtypeStruct((nblk, 8, 128), jnp.float32)
    out_spec = pl.BlockSpec((1, 8, 128), lambda i: (i, 0, 0))   # lane-dense, unmasked stores
    cparams = pltpu.CompilerParams(
        dimension_semantics=("parallel",),
        vmem_limit_bytes=_VMEM_LIMIT_BYTES)

    if same_transform:
        kernel = functools.partial(
            _ffl_diff_kernel, B=B, H_in=Hp, Hs=Hs, Ws=Ws,
            alpha=float(alpha), log_matrix=bool(log_matrix))
        partials = pl.pallas_call(
            kernel,
            out_shape=out_shape,
            grid=(nblk,),
            in_specs=[
                pl.BlockSpec((B * Hp, Wp), lambda i: (i, 0)),   # pred block (B images)
                pl.BlockSpec((B * Ht, Wt), lambda i: (i, 0)),   # target block (B images)
                const_spec((Wp, 2 * Ws)),                       # [C_W^T | S_W^T]
                const_spec((Hp, 2 * Hs)),                       # [C_H^T | S_H^T]
                const_spec((Ws, Hs)),                           # transposed band mask
            ],
            out_specs=out_spec,
            compiler_params=cparams,
        )(pred_flat, tgt_flat, mat(cs_w_pred), mat(cs_h_pred), jnp.asarray(mask_t))
    else:
        kernel = functools.partial(
            _ffl_two_spec_kernel, B=B, Hp=Hp, Ht=Ht, Hs=Hs, Ws=Ws,
            alpha=float(alpha), log_matrix=bool(log_matrix))
        partials = pl.pallas_call(
            kernel,
            out_shape=out_shape,
            grid=(nblk,),
            in_specs=[
                pl.BlockSpec((B * Hp, Wp), lambda i: (i, 0)),
                pl.BlockSpec((B * Ht, Wt), lambda i: (i, 0)),
                const_spec((Wp, 2 * Ws)),                       # pred [C_W^T | S_W^T]
                const_spec((Hp, 2 * Hs)),                       # pred [C_H^T | S_H^T]
                const_spec((Wt, 2 * Ws)),                       # target (pool folded)
                const_spec((Ht, 2 * Hs)),                       # target (pool folded)
                const_spec((Ws, Hs)),
            ],
            out_specs=out_spec,
            compiler_params=cparams,
        )(pred_flat, tgt_flat, mat(cs_w_pred), mat(cs_h_pred),
          mat(cs_w_tgt), mat(cs_h_tgt), jnp.asarray(mask_t))

    # Every lane of each (8,128) partial tile holds the same value; summing the whole
    # contiguous array (then dividing by the tile size) avoids a strided gather.
    total = jnp.sum(partials) * jnp.float32(1.0 / (8.0 * 128.0))
    loss = total / jnp.float32(NC * Hs * Ws)
    return loss * jnp.float32(loss_weight)


if __name__ == "__main__":
    key = jax.random.PRNGKey(0)
    k1, k2 = jax.random.split(key)
    N, C, H, W = 2, 4, 16, 16
    pred = jax.random.normal(k1, (N, C, H, W), dtype=jnp.float32)
    target = jax.random.normal(k2, (N, C, H, W), dtype=jnp.float32)

    loss = focal_frequency_loss_2d_pooling(
        pred, target,
        pass_manner='high', stage_manner='normal', ave_spectrum=False,
        loss_weight=1.0, alpha=1.0, pass_band=4)

    jax.block_until_ready(loss)
    print("KERNEL_OK")
</pallas_src>

<mosaic_0001>
module attributes {stable_mosaic.version = 11 : i64} {
  func.func @_ffl_diff_kernel(%arg0: i32, %arg1: memref<64x16xbf16, #tpu.memory_space<vmem>>, %arg2: memref<64x16xbf16, #tpu.memory_space<vmem>>, %arg3: memref<16x32xbf16, #tpu.memory_space<vmem>>, %arg4: memref<16x32xbf16, #tpu.memory_space<vmem>>, %arg5: memref<16x16xf32, #tpu.memory_space<vmem>>, %arg6: memref<1x8x128xf32, #tpu.memory_space<vmem>>) attributes {dimension_semantics = [#tpu.dimension_semantics<parallel>], iteration_bounds = array<i64: 2>, scalar_prefetch = 0 : i64, scratch_operands = 0 : i64, tpu.core_type = #tpu.core_type<tc>, window_params = [{transform_indices = @transform_0, window_bounds = array<i64: 64, 16>}, {transform_indices = @transform_1, window_bounds = array<i64: 64, 16>}, {pipeline_mode = #tpu.pipeline_mode<synchronous>, transform_indices = @transform_2, window_bounds = array<i64: 16, 32>}, {pipeline_mode = #tpu.pipeline_mode<synchronous>, transform_indices = @transform_3, window_bounds = array<i64: 16, 32>}, {pipeline_mode = #tpu.pipeline_mode<synchronous>, transform_indices = @transform_4, window_bounds = array<i64: 16, 16>}, {transform_indices = @transform_5, window_bounds = array<i64: 1, 8, 128>}]} {
    %c0 = arith.constant 0 : index
    %c0_0 = arith.constant 0 : index
    %0 = vector.load %arg1[%c0, %c0_0] : memref<64x16xbf16, #tpu.memory_space<vmem>>, vector<64x16xbf16>
    %c0_1 = arith.constant 0 : index
    %c0_2 = arith.constant 0 : index
    %1 = vector.load %arg2[%c0_1, %c0_2] : memref<64x16xbf16, #tpu.memory_space<vmem>>, vector<64x16xbf16>
    %2 = arith.subf %0, %1 : vector<64x16xbf16>
    %c0_3 = arith.constant 0 : index
    %c0_4 = arith.constant 0 : index
    %3 = vector.load %arg3[%c0_3, %c0_4] : memref<16x32xbf16, #tpu.memory_space<vmem>>, vector<16x32xbf16>
    %c0_5 = arith.constant 0 : index
    %c0_6 = arith.constant 0 : index
    %4 = vector.load %arg4[%c0_5, %c0_6] : memref<16x32xbf16, #tpu.memory_space<vmem>>, vector<16x32xbf16>
    %cst = arith.constant dense<0.000000e+00> : vector<64x32xf32>
    %5 = tpu.matmul %2, %3, %cst {dimension_numbers = #tpu.dot_dimension_numbers<[1], [0], [0], [1], [0, 0, 1, 1], [], []>} : vector<64x16xbf16>, vector<16x32xbf16>, vector<64x32xf32> -> vector<64x32xf32>
    %6 = vector.shape_cast %5 : vector<64x32xf32> to vector<4x16x32xf32>
    %7 = tpu.transpose %6, [0, 2, 1] : vector<4x16x32xf32> -> vector<4x32x16xf32>
    %8 = vector.shape_cast %7 : vector<4x32x16xf32> to vector<128x16xf32>
    %9 = arith.truncf %8 : vector<128x16xf32> to vector<128x16xbf16>
    %cst_7 = arith.constant dense<0.000000e+00> : vector<128x32xf32>
    %10 = tpu.matmul %9, %4, %cst_7 {dimension_numbers = #tpu.dot_dimension_numbers<[1], [0], [0], [1], [0, 0, 1, 1], [], []>} : vector<128x16xbf16>, vector<16x32xbf16>, vector<128x32xf32> -> vector<128x32xf32>
    %11 = vector.shape_cast %10 : vector<128x32xf32> to vector<4x32x32xf32>
    %12 = vector.extract_strided_slice %11 {offsets = [0, 0, 0], sizes = [4, 16, 16], strides = [1, 1, 1]} : vector<4x32x32xf32> to vector<4x16x16xf32>
    %13 = vector.extract_strided_slice %11 {offsets = [0, 0, 16], sizes = [4, 16, 16], strides = [1, 1, 1]} : vector<4x32x32xf32> to vector<4x16x16xf32>
    %14 = vector.extract_strided_slice %11 {offsets = [0, 16, 0], sizes = [4, 16, 16], strides = [1, 1, 1]} : vector<4x32x32xf32> to vector<4x16x16xf32>
    %15 = vector.extract_strided_slice %11 {offsets = [0, 16, 16], sizes = [4, 16, 16], strides = [1, 1, 1]} : vector<4x32x32xf32> to vector<4x16x16xf32>
    %16 = arith.subf %12, %15 : vector<4x16x16xf32>
    %17 = arith.addf %13, %14 : vector<4x16x16xf32>
    %cst_8 = arith.constant 0.000000e+00 : f32
    %18 = vector.broadcast %cst_8 : f32 to vector<4x16x16xf32>
    %19 = arith.subf %18, %17 : vector<4x16x16xf32>
    %20 = arith.mulf %16, %16 : vector<4x16x16xf32>
    %21 = arith.mulf %19, %19 : vector<4x16x16xf32>
    %22 = arith.addf %20, %21 : vector<4x16x16xf32>
    %c0_9 = arith.constant 0 : index
    %c0_10 = arith.constant 0 : index
    %23 = vector.load %arg5[%c0_9, %c0_10] : memref<16x16xf32, #tpu.memory_space<vmem>>, vector<16x16xf32>
    %24 = vector.shape_cast %23 : vector<16x16xf32> to vector<1x16x16xf32>
    %25 = vector.broadcast %24 : vector<1x16x16xf32> to vector<4x16x16xf32>
    %26 = arith.mulf %22, %25 : vector<4x16x16xf32>
    %27 = math.sqrt %26 : vector<4x16x16xf32>
    %cst_11 = arith.constant dense<0xFF800000> : vector<4x16xf32>
    %28 = vector.multi_reduction <maximumf>, %27, %cst_11 [2] : vector<4x16x16xf32> to vector<4x16xf32>
    %29 = vector.shape_cast %28 : vector<4x16xf32> to vector<4x16x1xf32>
    %cst_12 = arith.constant dense<0xFF800000> : vector<4x1xf32>
    %30 = vector.multi_reduction <maximumf>, %29, %cst_12 [1] : vector<4x16x1xf32> to vector<4x1xf32>
    %31 = vector.shape_cast %30 : vector<4x1xf32> to vector<4x1x1xf32>
    %cst_13 = arith.constant 1.000000e-30 : f32
    %32 = vector.broadcast %cst_13 : f32 to vector<4x1x1xf32>
    %33 = arith.maximumf %31, %32 : vector<4x1x1xf32>
    %cst_14 = arith.constant 1.000000e+00 : f32
    %34 = vector.broadcast %cst_14 : f32 to vector<4x1x1xf32>
    %35 = arith.divf %34, %33 : vector<4x1x1xf32>
    %36 = vector.broadcast %35 : vector<4x1x1xf32> to vector<4x16x16xf32>
    %37 = arith.mulf %27, %36 : vector<4x16x16xf32>
    %38 = arith.cmpf one, %37, %37 : vector<4x16x16xf32>
    %cst_15 = arith.constant 0.000000e+00 : f32
    %39 = vector.broadcast %cst_15 : f32 to vector<4x16x16xf32>
    %40 = arith.select %38, %39, %37 : vector<4x16x16xi1>, vector<4x16x16xf32>
    %cst_16 = arith.constant 0.000000e+00 : f32
    %cst_17 = arith.constant 1.000000e+00 : f32
    %41 = vector.broadcast %cst_16 : f32 to vector<4x16x16xf32>
    %42 = arith.maximumf %41, %40 : vector<4x16x16xf32>
    %43 = vector.broadcast %cst_17 : f32 to vector<4x16x16xf32>
    %44 = arith.minimumf %43, %42 : vector<4x16x16xf32>
    %45 = arith.mulf %44, %26 : vector<4x16x16xf32>
    %46 = vector.shape_cast %45 : vector<4x16x16xf32> to vector<1x4x16x16xf32>
    %cst_18 = arith.constant dense<0.000000e+00> : vector<1xf32>
    %47 = vector.multi_reduction <add>, %46, %cst_18 [1, 2, 3] : vector<1x4x16x16xf32> to vector<1xf32>
    %48 = vector.shape_cast %47 : vector<1xf32> to vector<1x1x1x1xf32>
    %49 = vector.extract %48[0, 0, 0, 0] : f32 from vector<1x1x1x1xf32>
    %50 = vector.broadcast %49 : f32 to vector<1x8x128xf32>
    %c0_19 = arith.constant 0 : index
    %c0_20 = arith.constant 0 : index
    %c0_21 = arith.constant 0 : index
    %51 = vector.load %arg6[%c0_19, %c0_20, %c0_21] : memref<1x8x128xf32, #tpu.memory_space<vmem>>, vector<1x8x128xf32>
    tpu.vector_store %arg6[%c0_19, %c0_20, %c0_21], %50 {strides = array<i32>} : memref<1x8x128xf32, #tpu.memory_space<vmem>>, vector<1x8x128xf32>,
    return
  }
  func.func @transform_0(%arg0: i32) -> (i32, i32) {
    %c0_i32 = arith.constant 0 : i32
    %c0_i32_0 = arith.constant 0 : i32
    return %arg0, %c0_i32 : i32, i32
  }
  func.func @transform_1(%arg0: i32) -> (i32, i32) {
    %c0_i32 = arith.constant 0 : i32
    %c0_i32_0 = arith.constant 0 : i32
    return %arg0, %c0_i32 : i32, i32
  }
  func.func @transform_2(%arg0: i32) -> (i32, i32) {
    %c0_i32 = arith.constant 0 : i32
    %c0_i32_0 = arith.constant 0 : i32
    %c0_i32_1 = arith.constant 0 : i32
    return %c0_i32, %c0_i32_0 : i32, i32
  }
  func.func @transform_3(%arg0: i32) -> (i32, i32) {
    %c0_i32 = arith.constant 0 : i32
    %c0_i32_0 = arith.constant 0 : i32
    %c0_i32_1 = arith.constant 0 : i32
    return %c0_i32, %c0_i32_0 : i32, i32
  }
  func.func @transform_4(%arg0: i32) -> (i32, i32) {
    %c0_i32 = arith.constant 0 : i32
    %c0_i32_0 = arith.constant 0 : i32
    %c0_i32_1 = arith.constant 0 : i32
    return %c0_i32, %c0_i32_0 : i32, i32
  }
  func.func @transform_5(%arg0: i32) -> (i32, i32, i32) {
    %c0_i32 = arith.constant 0 : i32
    %c0_i32_0 = arith.constant 0 : i32
    %c0_i32_1 = arith.constant 0 : i32
    return %arg0, %c0_i32, %c0_i32_0 : i32, i32, i32
  }
}

</mosaic_0001>

<bundles_post_ra>
// kernel: tpu_custom_call.1
= control target key start
LH: loop header
LB: loop body
LE: loop exit
PB: predicated region body
PF: predicated region fallthrough
CT: control target
= control target key end

     0   :  { %10 = vsyncpa [#allocation3], 0  ;;  %s1628_s0 = inlined_call_operand.vmem [shape: bf16[128,16], index: 0, kind: input, shape index: {}]   ;;  %s1629_s1 = inlined_call_operand.vmem [shape: bf16[128,16], index: 1, kind: input, shape index: {}]   ;;  %s1630_s2 = inlined_call_operand.vmem [shape: bf16[16,32], index: 2, kind: input, shape index: {}]   ;;  %s1631_s3 = inlined_call_operand.vmem [shape: bf16[16,32], index: 3, kind: input, shape index: {}]   ;;  %s1632_s4 = inlined_call_operand.vmem [shape: f32[16,16], index: 4, kind: input, shape index: {}]   ;;  %s1633_s5 = inlined_call_operand.hbm [shape: f32[2,8,128], index: 5, kind: output, shape index: {}]  }
   0x1   :  { %12 = vsyncpa [#allocation3 + $0x1], 0  ;;  %s1334_s18 = smov 0   ;;  %s1336_s19 = smov 0  }
   0x2   :  { %s1338_s20 = smov 0   ;;  %s1340_s21 = smov 0  }
   0x3 LB: > { %s1355_s22 = sadd.s32 4294967295, %s1299_s21   ;;  %s1068_s23 = sadd.s32 4294967294, %s1299_s21   ;;  %s1299_s21 = sphi %s1340_s21, %s1639_s21   ;;  %s1295_s20 = sphi %s1338_s20, %s1638_s20   ;;  %s1291_s19 = sphi %s1336_s19, %s1637_s19   ;;  %s1287_s18 = sphi %s1334_s18, %s1636_s18  }
   0x4   : > { %s1359_s24 = sadd.s32 1, %s1299_s21   ;;  %s140_s25 = sadd.s32 1, %s1295_s20 }
   0x5   : > { %s137_s26 = ssub.s32 %s1299_s21, %s1359_s24  ;;  %p150_p0 = scmp.ne.s32.totalorder %s1295_s20, %s1291_s19 }
   0x6   : > { %p138_p1 = scmp.eq.s32.totalorder %s137_s26, 0  ;;  %p151_p2 = scmp.eq.s32.totalorder %s1355_s22, 1 }
   0x7   : > { %p156_p3 = scmp.ne.s32.totalorder %s1291_s19, %s1287_s18  ;;  %p157_p4 = scmp.eq.s32.totalorder %s1068_s23, 1 }
   0x8   : > { %s1370_s27 = scalar_select %p138_p1, %s1295_s20, %s140_s25  }
   0x9   : > { %p1372_p5 = por %p151_p2, %p150_p0  ;;  %p1376_p6 = por %p157_p4, %p156_p3 }
   0xa   : > { %p1071_p7 = scmp.ge.s32.totalorder %s1299_s21, 1  ;;  %p202_p8 = scmp.lt.s32.totalorder %s1299_s21, 3 }
   0xc   : > { %p203_p9 = pnand %p1071_p7, %p202_p8 }
   0xd   : > { %v1211_v0 = vld [vmem:[%s1630_s2] sm:$0xff] (!%p203_p9)   ;;  %s1073_s7 = sshll.u32 (!%p203_p9), %s1355_s22, 3  ;;  %vm302_vm0 = vcmask (!%p203_p9), 130048   ;;  %s1301_s17 = smov (!%p203_p9), 16  }
   0xe   : > { %206 = sbr.rel (%p203_p9) target bundleno = 1287 (0x507), region = 40  ;;  %p236_p10 = scmp.lt.s32.totalorder (!%p203_p9), %s1073_s7, 15  ;;  %1113 = vmatprep.subr.bf16.mxu0 (!%p203_p9), %v1211_v0  ;;  %v1212_v29 = vld [vmem:[%s1631_s3] sm:$0xff] (!%p203_p9)  }
   0xf   : > { %1114 = vmatpush3.bf16.msra.mxu0 (!%p203_p9), %v1211_v0  ;;  %1141 = vmatprep.subr.bf16.mxu1 (!%p203_p9), %v1212_v29  ;;  %s1302_s23 = smov (!%p203_p9), 112  }
  0x10   : > { %1123 = vmatprep.subr.bf16.mxu0 (!%p203_p9), %v1212_v29  ;;  %1142 = vmatpush3.bf16.msra.mxu1 (!%p203_p9), %v1212_v29 }
  0x15   : > { %s1641_s7 = smov (!%p236_p10, %s1073_s7), 15 }
  0x16   : > { %s1074_s8 = sshll.u32 %s1641_s7, 2  ;;  %s232_s7 = sand.u32 1, %s1291_s19  }
  0x17   : > { %s239_s11 = scalar_lea.vmem %s1628_s0, %s1074_s8  ;;  %s245_s14 = scalar_lea.vmem %s1629_s1, %s1074_s8 }
  0x18   : > { %v248_v1 = vld [vmem:[%s239_s11] sm:$0xf]  ;;  %v249_v2 = vld [vmem:[%s239_s11 + $0x4] sm:$0xf]  ;;  %v250_v6 = vld [vmem:[%s239_s11 + $0x8] sm:$0xf] }
  0x19   : > { %v256_v3 = vld [vmem:[%s245_s14] sm:$0xf]  ;;  %v257_v4 = vld [vmem:[%s245_s14 + $0x4] sm:$0xf]  ;;  %v251_v7 = vld [vmem:[%s239_s11 + $0xc] sm:$0xf] }
  0x1a   : > { %v264_v5 = vsub.bf16 %v248_v1, %v256_v3  ;;  %v265_v8 = vsub.bf16 %v249_v2, %v257_v4  ;;  %v258_v9 = vld [vmem:[%s245_s14 + $0x8] sm:$0xf]  ;;  %v259_v10 = vld [vmem:[%s245_s14 + $0xc] sm:$0xf]  ;;  %v252_v11 = vld [vmem:[%s239_s11 + $0x10] sm:$0xf] }
  0x1b   : > { %v266_v12 = vsub.bf16 %v250_v6, %v258_v9  ;;  %v267_v13 = vsub.bf16 %v251_v7, %v259_v10  ;;  %v253_v14 = vld [vmem:[%s239_s11 + $0x14] sm:$0xf]  ;;  %v260_v15 = vld [vmem:[%s245_s14 + $0x10] sm:$0xf]  ;;  %v254_v20 = vld [vmem:[%s239_s11 + $0x18] sm:$0xf] }
  0x1c   : > { %v261_v16 = vld [vmem:[%s245_s14 + $0x14] sm:$0xf]  ;;  %v1077_v17 = vcombine.low %v264_v5, %v265_v8  ;;  %v268_v18 = vsub.bf16 %v252_v11, %v260_v15  ;;  %v255_v21 = vld [vmem:[%s239_s11 + $0x1c] sm:$0xf]  ;;  %v262_v22 = vld [vmem:[%s245_s14 + $0x18] sm:$0xf] }
  0x1d   : > { %v269_v19 = vsub.bf16 %v253_v14, %v261_v16  ;;  %v1078_v23 = vcombine.low %v266_v12, %v267_v13  ;;  %v263_v24 = vld [vmem:[%s245_s14 + $0x1c] sm:$0xf]  ;;  %v270_v26 = vsub.bf16 %v254_v20, %v262_v22  ;;  %s1072_s8 = sshll.u32 %s232_s7, 3  ;;  %s1096_s11 = sshll.u32 %s1355_s22, 7 }
  0x1e   : > { %1115 = vmatprep.mubr.msk.bf16.mxu0 %vm302_vm0, %v1077_v17  ;;  %v271_v27 = vsub.bf16 %v255_v21, %v263_v24  ;;  %s234_s9 = scalar_lea.vmem [#allocation2], %s1072_s8  ;;  %s1588_s15 = scalar_lea.hbm %s1633_s5, %s1096_s11 }
  0x1f   : > { %v1079_v25 = vcombine.low %v268_v18, %v269_v19  ;;  %1116 = vmatmul.mubr.msk.bf16.vlgmr.msra.gmra.mrb[0].mxu0 %vm302_vm0, %v1078_v23  ;;  %s997_s10 = sshll.u32 %s234_s9, 4  ;;  %s984_s16 = scalar_lea.sflag [#allocation3], %s232_s7  ;;  %s1583_s10 = int_to_ptr.vmem [resolvable:$true] %s997_s10 }
  0x20   : > { %v1080_v28 = vcombine.low %v270_v26, %v271_v27  ;;  %1124 = vmatpush3.bf16.msra.mxu0 %v1212_v29  ;;  %s1303_s22 = smov [#allocation2]  }
  0x21   : > { %1119 = vmatprep.mubr.msk.bf16.mxu0 %vm302_vm0, %v1079_v25 }
  0x27   : > { %1120 = vmatmul.mubr.msk.bf16.gmra.mrb[4].mxu0 %vm302_vm0, %v1080_v28 }
  0xf2   : > { %v1117_v30 = vpop.f32.mrb[0].mxu0 }
  0xf3   : > { %v349_v31 = vpop.f32.mrb[1].mxu0 }
  0xf4   : > { %v1118_v32 = vpop.f32.mrb[2].mxu0  ;;  %v1187_v33 = vpack.i.bf16 %v349_v31, %v1117_v30 }
  0xf5   : > { %v352_v34 = vpop.f32.mrb[3].mxu0 }
  0xf6   : > { %v1189_v35 = vpack.i.bf16 %v352_v34, %v1118_v32  ;;  %1188 = vxpose.xlu0.b32.start [1/2] (short) (narrow) %v1187_v33, 32 }
  0xfa   : > { %1190 = vxpose.xlu0.b32.end [2/2] (short) (narrow) %v1189_v35, 32  ;;  %v1121_v36 = vpop.f32.mrb[4].mxu0 }
  0xfb   : > { %v365_v37 = vpop.f32.mrb[5].mxu0 }
  0xfc   : > { %444 = vxpose.xlu1.b32.start [1/2] (short) (narrow) %v365_v37, 32  ;;  %v1122_v38 = vpop.f32.mrb[6].mxu0 }
  0xfd   : > { %v368_v39 = vpop.f32.mrb[7].mxu0 }
 0x100   : > { %445 = vxpose.xlu1.b32.end [2/2] (short) (narrow) %v368_v39, 32 }
 0x103   : > { %476 = vxpose.xlu0.b32.start [1/2] (short) (narrow) %v1121_v36, 32 }
 0x107   : > { %477 = vxpose.xlu0.b32.end [2/2] (short) (narrow) %v1122_v38, 32 }
 0x176   : > { %v1191_v40 = vpop.trf.xlu0 }
 0x177   : > { %v1195_v41 = vunpack.i.h.bf16 %v1191_v40  ;;  %v1192_v43 = vunpack.i.l.bf16 %v1191_v40 }
 0x17a   : > { %v1196_v42 = vpop.trf.xlu0 }
 0x17b   : > { %v1200_v44 = vunpack.i.h.bf16 %v1196_v42  ;;  %v1197_v45 = vunpack.i.l.bf16 %v1196_v42 }
 0x17c   : > { %v460_v46 = vpop.trf.xlu1 }
 0x17d   : > { %v508_v47 = vpack.c.bf16 %v1200_v44, %v1195_v41  ;;  %v510_v48 = vpack.c.bf16 %v1197_v45, %v1192_v43 }
 0x17e   : > { %v1201_v49 = vpop.trf.xlu0 }
 0x17f   : > { %1125 = vmatprep.mubr.msk.bf16.mxu0 %vm302_vm0, %v508_v47  ;;  %1129 = vmatprep.mubr.msk.bf16.mxu1 %vm302_vm0, %v510_v48  ;;  %v1205_v51 = vunpack.i.h.bf16 %v1201_v49  ;;  %v1202_v52 = vunpack.i.l.bf16 %v1201_v49 }
 0x180   : > { %v461_v50 = vpop.trf.xlu1 }
 0x181   : > { %v512_v56 = vpack.c.bf16 %v461_v50, %v460_v46 }
 0x182   : > { %v1206_v53 = vpop.trf.xlu0 }
 0x183   : > { %v1210_v54 = vunpack.i.h.bf16 %v1206_v53  ;;  %v1207_v55 = vunpack.i.l.bf16 %v1206_v53 }
 0x184   : > { %v462_v57 = vpop.trf.xlu1 }
 0x185   : > { %v509_v58 = vpack.c.bf16 %v1210_v54, %v1205_v51  ;;  %v511_v59 = vpack.c.bf16 %v1207_v55, %v1202_v52 }
 0x186   : > { %v492_v60 = vpop.trf.xlu0 }
 0x187   : > { %1126 = vmatmul.mubr.msk.bf16.vlgmr.msra.gmra.mrb[8].mxu0 %vm302_vm0, %v509_v58  ;;  %1130 = vmatmul.mubr.msk.bf16.vlgmr.msra.gmra.mrb[0].mxu1 %vm302_vm0, %v511_v59 }
 0x188   : > { %1133 = vmatprep.mubr.msk.bf16.mxu1 %vm302_vm0, %v512_v56  ;;  %v463_v61 = vpop.trf.xlu1 }
 0x189   : > { %v513_v63 = vpack.c.bf16 %v463_v61, %v462_v57 }
 0x18a   : > { %v493_v62 = vpop.trf.xlu0 }
 0x18b   : > { %v514_v0 = vpack.c.bf16 %v493_v62, %v492_v60  ;;  %v779_v62 = vld [vmem:[%s1632_s4] sm:$0xff] }
 0x18e   : > { %v494_v1 = vpop.trf.xlu0 }
 0x18f   : > { %1134 = vmatmul.mubr.msk.bf16.gmra.mrb[4].mxu1 %vm302_vm0, %v513_v63 }
 0x190   : > { %1137 = vmatprep.mubr.msk.bf16.mxu1 %vm302_vm0, %v514_v0 }
 0x192   : > { %v495_v2 = vpop.trf.xlu0 }
 0x193   : > { %v515_v3 = vpack.c.bf16 %v495_v2, %v494_v1 }
 0x197   : > { %1138 = vmatmul.mubr.msk.bf16.gmra.mrb[8].mxu1 %vm302_vm0, %v515_v3 }
 0x25a   : > { %v1127_v4 = vpop.f32.mrb[8].mxu0  ;;  %v1131_v5 = vpop.f32.mrb[0].mxu1 }
 0x25b   : > { %v1407_v6 = vpop.f32.mrb[1].mxu1  ;;  %683 = vrot.lane.b32.xlu1 %v1127_v4, %s1301_s17  ;;  %v1409_v7 = vpop.f32.mrb[9].mxu0 }
 0x25c   : > { %v1128_v8 = vpop.f32.mrb[10].mxu0  ;;  %v1132_v9 = vpop.f32.mrb[2].mxu1 }
 0x25d   : > { %v1411_v10 = vpop.f32.mrb[3].mxu1  ;;  %685 = vrot.lane.b32.xlu0 %v1128_v8, %s1301_s17  ;;  %v1413_v11 = vpop.f32.mrb[11].mxu0 }
 0x25f   : > { %687 = vrot.lane.b32.xlu1 %v1131_v5, %s1301_s17 }
 0x261   : > { %651 = vrot.lane.b32.xlu0 %v1127_v4, %s1302_s23 }
 0x262   : > { %v1135_v12 = vpop.f32.mrb[4].mxu1 }
 0x263   : > { %v1416_v13 = vpop.f32.mrb[5].mxu1  ;;  %689 = vrot.lane.b32.xlu1 %v1132_v9, %s1301_s17 }
 0x264   : > { %v1136_v14 = vpop.f32.mrb[6].mxu1 }
 0x265   : > { %v1418_v15 = vpop.f32.mrb[7].mxu1  ;;  %655 = vrot.lane.b32.xlu0 %v1131_v5, %s1302_s23  ;;  %v780_v5 = vld [vmem:[%s1632_s4 + $0x8] sm:$0xff] }
 0x267   : > { %691 = vrot.lane.b32.xlu1 %v1135_v12, %s1301_s17 }
 0x269   : > { %659 = vrot.lane.b32.xlu0 %v1135_v12, %s1302_s23 }
 0x26a   : > { %v1139_v16 = vpop.f32.mrb[8].mxu1 }
 0x26b   : > { %v1422_v17 = vpop.f32.mrb[9].mxu1  ;;  %693 = vrot.lane.b32.xlu1 %v1136_v14, %s1301_s17 }
 0x26c   : > { %v1140_v18 = vpop.f32.mrb[10].mxu1 }
 0x26d   : > { %v1424_v19 = vpop.f32.mrb[11].mxu1 }
 0x26f   : > { %695 = vrot.lane.b32.xlu1 %v1139_v16, %s1301_s17 }
 0x273   : > { %697 = vrot.lane.b32.xlu1 %v1140_v18, %s1301_s17  ;;  %s1237_s17 = scalar_lea.vmem %s1583_s10, 128 }
 0x274   : > { %p1238_p11 = scmp.ne.s32.totalorder %s1583_s10, %s1237_s17 }
 0x276   : > { %p1239_p12 = pnand %p1238_p11, %p1372_p5 }
 0x277   : > { %653 = vrot.lane.b32.xlu1 %v1128_v8, %s1302_s23 }
 0x278   : > { %p1240_p13 = pneg %p1239_p12 }
 0x27b   : > { %657 = vrot.lane.b32.xlu1 %v1132_v9, %s1302_s23 }
 0x27f   : > { %661 = vrot.lane.b32.xlu1 %v1136_v14, %s1302_s23 }
 0x2cd   : > { %v684_v20 = vpop.permute.xlu1 %683 }
 0x2ce   : > { %v707_v22 = vadd.f32 %v684_v20, %v1409_v7 }
 0x2cf   : > { %v686_v24 = vpop.permute.xlu0 %685 }
 0x2d0   : > { %v715_v27 = vsub.f32 0.0, %v707_v22  ;;  %v708_v28 = vadd.f32 %v686_v24, %v1413_v11 }
 0x2d1   : > { %v688_v21 = vpop.permute.xlu1 %687 }
 0x2d2   : > { %v709_v23 = vadd.f32 %v688_v21, %v1407_v6  ;;  %v731_v33 = vmul.f32 %v715_v27, %v715_v27  ;;  %v716_v34 = vsub.f32 0.0, %v708_v28 }
 0x2d3   : > { %v652_v52 = vpop.permute.xlu0 %651 }
 0x2d4   : > { %v717_v25 = vsub.f32 0.0, %v709_v23  ;;  %v732_v38 = vmul.f32 %v716_v34, %v716_v34  ;;  %v675_v58 = vsub.f32 %v1409_v7, %v652_v52 }
 0x2d5   : > { %v690_v26 = vpop.permute.xlu1 %689 }
 0x2d6   : > { %v733_v29 = vmul.f32 %v717_v25, %v717_v25  ;;  %v710_v30 = vadd.f32 %v690_v26, %v1411_v10  ;;  %v723_v1 = vmul.f32 %v675_v58, %v675_v58 }
 0x2d7   : > { %v656_v54 = vpop.permute.xlu0 %655 }
 0x2d8   : > { %v718_v31 = vsub.f32 0.0, %v710_v30  ;;  %751 = vrot.lane.b32.xlu0 %v733_v29, %s1302_s23  ;;  %v677_v56 = vsub.f32 %v1407_v6, %v656_v54 }
 0x2d9   : > { %v692_v32 = vpop.permute.xlu1 %691 }
 0x2da   : > { %v734_v35 = vmul.f32 %v718_v31, %v718_v31  ;;  %v711_v36 = vadd.f32 %v692_v32, %v1416_v13  ;;  %v725_v59 = vmul.f32 %v677_v56, %v677_v56 }
 0x2db   : > { %v660_v57 = vpop.permute.xlu0 %659 }
 0x2dc   : > { %753 = vrot.lane.b32.xlu1 %v734_v35, %s1302_s23  ;;  %747 = vrot.lane.b32.xlu0 %v731_v33, %s1302_s23  ;;  %v719_v39 = vsub.f32 0.0, %v711_v36 }
 0x2dd   : > { %v694_v37 = vpop.permute.xlu1 %693 }
 0x2de   : > { %v712_v40 = vadd.f32 %v694_v37, %v1418_v15  ;;  %v735_v42 = vmul.f32 %v719_v39, %v719_v39 }
 0x2e0   : > { %663 = vrot.lane.b32.xlu0 %v1139_v16, %s1302_s23  ;;  %749 = vrot.lane.b32.xlu1 %v732_v38, %s1302_s23  ;;  %v720_v43 = vsub.f32 0.0, %v712_v40 }
 0x2e1   : > { %v696_v41 = vpop.permute.xlu1 %695 }
 0x2e2   : > { %v713_v44 = vadd.f32 %v696_v41, %v1422_v17  ;;  %v736_v47 = vmul.f32 %v720_v43, %v720_v43 }
 0x2e4   : > { %v721_v45 = vsub.f32 0.0, %v713_v44  ;;  %755 = vrot.lane.b32.xlu0 %v735_v42, %s1302_s23  ;;  %665 = vrot.lane.b32.xlu1 %v1140_v18, %s1302_s23 }
 0x2e5   : > { %v698_v46 = vpop.permute.xlu1 %697 }
 0x2e6   : > { %v737_v48 = vmul.f32 %v721_v45, %v721_v45  ;;  %v714_v49 = vadd.f32 %v698_v46, %v1424_v19 }
 0x2e8   : > { %v722_v50 = vsub.f32 0.0, %v714_v49  ;;  %759 = vrot.lane.b32.xlu0 %v737_v48, %s1302_s23  ;;  %757 = vrot.lane.b32.xlu1 %v736_v47, %s1302_s23 }
 0x2e9   : > { %v654_v53 = vpop.permute.xlu1 %653 }
 0x2ea   : > { %v738_v51 = vmul.f32 %v722_v50, %v722_v50  ;;  %v676_v2 = vsub.f32 %v1413_v11, %v654_v53 }
 0x2ec   : > { %761 = vrot.lane.b32.xlu1 %v738_v51, %s1302_s23  ;;  %v724_v12 = vmul.f32 %v676_v2, %v676_v2  ;;  %s1241_s23 = sshll.u32 %s1303_s22, 4  ;;  %s1242_s23 = int_to_ptr.vmem [resolvable:$false] %s1241_s23 }
 0x2ed   : > { %v658_v55 = vpop.permute.xlu1 %657  ;;  %s1243_s25 = scalar_lea.vmem %s1242_s23, 256  ;;  %p1244_p0 = scmp.lt.s32.totalorder %s1583_s10, %s1242_s23 }
 0x2ee   : > { %v678_v60 = vsub.f32 %v1411_v10, %v658_v55  ;;  %v679_v10 = vsub.f32 %v1416_v13, %v660_v57  ;;  %p1245_p1 = scmp.lt.s32.totalorder %s1243_s25, %s1237_s17 }
 0x2f0   : > { %v726_v3 = vmul.f32 %v678_v60, %v678_v60  ;;  %v727_v21 = vmul.f32 %v679_v10, %v679_v10  ;;  %p1246_p2 = por %p1245_p1, %p1244_p0 }
 0x2f1   : > { %v662_v61 = vpop.permute.xlu1 %661 }
 0x2f2   : > { %v680_v22 = vsub.f32 %v1418_v15, %v662_v61  ;;  %p1247_p3 = pnand %p1246_p2, %p1240_p13 }
 0x2f4   : > { %v728_v28 = vmul.f32 %v680_v22, %v680_v22 }
 0x34a   : > { %v752_v63 = vpop.permute.xlu0 %751 }
 0x34b   : > { %v773_v0 = vadd.f32 %v752_v63, %v725_v59 }
 0x34d   : > { %v1454_v4 = vmul.f32 %v779_v62, %v773_v0 }
 0x34e   : > { %v754_v6 = vpop.permute.xlu1 %753  ;;  %v748_v7 = vpop.permute.xlu0 %747 }
 0x34f   : > { %v774_v8 = vadd.f32 %v754_v6, %v726_v3  ;;  %v771_v9 = vadd.f32 %v748_v7, %v723_v1  ;;  %1213 = vrsqrt.f32 %v1454_v4  ;;  %vm805_vm2 = vcmp.eq.f32.partialorder %v1454_v4, inf }
 0x350   : > { %v808_v49 = vand.u32 2147483648, %v1454_v4  ;;  %vm807_vm4 = vcmp.eq.f32.partialorder %v1454_v4, 0.0 }
 0x351   : > { %v1461_v14 = vmul.f32 %v780_v5, %v774_v8  ;;  %v1463_v16 = vmul.f32 %v779_v62, %v771_v9 }
 0x352   : > { %v664_v11 = vpop.permute.xlu0 %663  ;;  %v750_v18 = vpop.permute.xlu1 %749 }
 0x353   : > { %v772_v20 = vadd.f32 %v750_v18, %v724_v12  ;;  %1215 = vrsqrt.f32 %v1463_v16  ;;  %v681_v23 = vsub.f32 %v1422_v17, %v664_v11  ;;  %vm791_vm1 = vcmp.eq.f32.partialorder %v1463_v16, inf }
 0x354   : > { %1217 = vrsqrt.f32 %v1461_v14  ;;  %vm793_vm3 = vcmp.eq.f32.partialorder %v1463_v16, 0.0  ;;  %v794_v42 = vand.u32 2147483648, %v1463_v16  ;;  %vm812_vm5 = vcmp.eq.f32.partialorder %v1461_v14, inf }
 0x355   : > { %v1469_v24 = vmul.f32 %v780_v5, %v772_v20  ;;  %v729_v29 = vmul.f32 %v681_v23, %v681_v23  ;;  %v815_v58 = vand.u32 2147483648, %v1461_v14  ;;  %vm814_vm8 = vcmp.eq.f32.partialorder %v1461_v14, 0.0 }
 0x356   : > { %v756_v13 = vpop.permute.xlu0 %755  ;;  %v666_v25 = vpop.permute.xlu1 %665 }
 0x357   : > { %v775_v26 = vadd.f32 %v756_v13, %v727_v21  ;;  %1219 = vrsqrt.f32 %v1469_v24  ;;  %v682_v31 = vsub.f32 %v1424_v19, %v666_v25  ;;  %vm798_vm6 = vcmp.eq.f32.partialorder %v1469_v24, inf }
 0x358   : > { %v801_v53 = vand.u32 2147483648, %v1469_v24  ;;  %vm800_vm7 = vcmp.eq.f32.partialorder %v1469_v24, 0.0 }
 0x359   : > { %v1214_v27 = vpop.eup %1213  ;;  %v1472_v30 = vmul.f32 %v779_v62, %v775_v26  ;;  %v730_v36 = vmul.f32 %v682_v31, %v682_v31 }
 0x35a   : > { %v760_v32 = vpop.permute.xlu0 %759  ;;  %v758_v33 = vpop.permute.xlu1 %757  ;;  %v804_v17 = vmul.f32 %v1214_v27, %v1454_v4 }
 0x35b   : > { %v777_v34 = vadd.f32 %v760_v32, %v729_v29  ;;  %v776_v15 = vadd.f32 %v758_v33, %v728_v28  ;;  %1221 = vrsqrt.f32 %v1472_v30  ;;  %vm819_vm9 = vcmp.eq.f32.partialorder %v1472_v30, inf }
 0x35c   : > { %v806_v44 = vsel %vm805_vm2, %v1454_v4, %v804_v17  ;;  %v822_v63 = vand.u32 2147483648, %v1472_v30  ;;  %vm821_vm10 = vcmp.eq.f32.partialorder %v1472_v30, 0.0 }
 0x35d   : > { %v1216_v35 = vpop.eup %1215  ;;  %v1477_v37 = vmul.f32 %v779_v62, %v777_v34  ;;  %v1479_v38 = vmul.f32 %v780_v5, %v776_v15  ;;  %v1501_v52 = vsel %vm807_vm4, %v808_v49, %v806_v44 }
 0x35e   : > { %v1218_v39 = vpop.eup %1217  ;;  %v762_v40 = vpop.permute.xlu1 %761  ;;  %v790_v41 = vmul.f32 %v1216_v35, %v1463_v16  ;;  %v851_v59 = vsel %vm302_vm0, %v1501_v52, -inf }
 0x35f   : > { %v778_v19 = vadd.f32 %v762_v40, %v730_v36  ;;  %1223 = vrsqrt.f32 %v1479_v38  ;;  %v811_v45 = vmul.f32 %v1218_v39, %v1461_v14  ;;  %vm826_vm11 = vcmp.eq.f32.partialorder %v1479_v38, inf }
 0x360   : > { %v792_v43 = vsel %vm791_vm1, %v1463_v16, %v790_v41  ;;  %1225 = vrsqrt.f32 %v1477_v37  ;;  %v829_v8 = vand.u32 2147483648, %v1479_v38  ;;  %vm828_vm12 = vcmp.eq.f32.partialorder %v1479_v38, 0.0 }
 0x361   : > { %v1220_v46 = vpop.eup %1219  ;;  %v1491_v47 = vmul.f32 %v780_v5, %v778_v19  ;;  %v1493_v48 = vsel %vm793_vm3, %v794_v42, %v792_v43  ;;  %v813_v55 = vsel %vm812_vm5, %v1461_v14, %v811_v45  ;;  %vm833_vm13 = vcmp.eq.f32.partialorder %v1477_v37, inf }
 0x362   : > { %v845_v50 = vsel %vm302_vm0, %v1493_v48, -inf  ;;  %v797_v51 = vmul.f32 %v1220_v46, %v1469_v24  ;;  %v1518_v62 = vsel %vm814_vm8, %v815_v58, %v813_v55  ;;  %v836_v12 = vand.u32 2147483648, %v1477_v37 }
 0x363   : > { %846 = vmax.xlane.f32.xlu0 %v845_v50  ;;  %1227 = vrsqrt.f32 %v1491_v47  ;;  %v854_v5 = vsel %vm302_vm0, %v1518_v62, -inf  ;;  %vm835_vm14 = vcmp.eq.f32.partialorder %v1477_v37, 0.0  ;;  %vm840_vm15 = vcmp.eq.f32.partialorder %v1491_v47, inf }
 0x364   : > { %v799_v54 = vsel %vm798_vm6, %v1469_v24, %v797_v51  ;;  %v843_v25 = vand.u32 2147483648, %v1491_v47  ;;  %vm842_vm1 = vcmp.eq.f32.partialorder %v1491_v47, 0.0 }
 0x365   : > { %v1222_v56 = vpop.eup %1221  ;;  %v1509_v57 = vsel %vm800_vm7, %v801_v53, %v799_v54 }
 0x366   : > { %v848_v60 = vsel %vm302_vm0, %v1509_v57, -inf  ;;  %v818_v61 = vmul.f32 %v1222_v56, %v1472_v30 }
 0x367   : > { %852 = vmax.xlane.f32.xlu0 %v851_v59  ;;  %849 = vmax.xlane.f32.xlu1 %v848_v60 }
 0x368   : > { %v820_v0 = vsel %vm819_vm9, %v1472_v30, %v818_v61 }
 0x369   : > { %v1224_v1 = vpop.eup %1223  ;;  %v1524_v2 = vsel %vm821_vm10, %v822_v63, %v820_v0 }
 0x36a   : > { %v1226_v3 = vpop.eup %1225  ;;  %v857_v6 = vsel %vm302_vm0, %v1524_v2, -inf  ;;  %v825_v7 = vmul.f32 %v1224_v1, %v1479_v38 }
 0x36b   : > { %855 = vmax.xlane.f32.xlu0 %v854_v5  ;;  %858 = vmax.xlane.f32.xlu1 %v857_v6  ;;  %v832_v9 = vmul.f32 %v1226_v3, %v1477_v37 }
 0x36c   : > { %v827_v10 = vsel %vm826_vm11, %v1479_v38, %v825_v7 }
 0x36d   : > { %v1228_v11 = vpop.eup %1227  ;;  %v1538_v18 = vsel %vm828_vm12, %v829_v8, %v827_v10  ;;  %v834_v20 = vsel %vm833_vm13, %v1477_v37, %v832_v9 }
 0x36e   : > { %v860_v21 = vsel %vm302_vm0, %v1538_v18, -inf  ;;  %v1544_v22 = vsel %vm835_vm14, %v836_v12, %v834_v20  ;;  %v839_v23 = vmul.f32 %v1228_v11, %v1491_v47 }
 0x36f   : > { %861 = vmax.xlane.f32.xlu0 %v860_v21  ;;  %v863_v13 = vsel %vm302_vm0, %v1544_v22, -inf }
 0x370   : > { %864 = vmax.xlane.f32.xlu1 %v863_v13  ;;  %v841_v26 = vsel %vm840_vm15, %v1491_v47, %v839_v23 }
 0x371   : > { %v1553_v27 = vsel %vm842_vm1, %v843_v25, %v841_v26 }
 0x372   : > { %v866_v28 = vsel %vm302_vm0, %v1553_v27, -inf }
 0x373   : > { %867 = vmax.xlane.f32.xlu0 %v866_v28 }
 0x3f0   : > { %v847_v29 = vpop.xlane.xlu0 %846 }
 0x3f4   : > { %v853_v31 = vpop.xlane.xlu0 %852  ;;  %v850_v32 = vpop.xlane.xlu1 %849 }
 0x3f5   : > { %v869_v33 = vmax.f32 %v847_v29, %v850_v32 }
 0x3f7   : > { %v870_v34 = vrot.slane %v869_v33, 4 }
 0x3f8   : > { %v856_v15 = vpop.xlane.xlu0 %855  ;;  %v859_v36 = vpop.xlane.xlu1 %858 }
 0x3f9   : > { %v871_v17 = vmax.f32 %v869_v33, %v870_v34  ;;  %v876_v35 = vmax.f32 %v853_v31, %v856_v15 }
 0x3fb   : > { %v872_v39 = vrot.slane %v871_v17, 2  ;;  %v877_v40 = vrot.slane %v876_v35, 4 }
 0x3fc   : > { %v862_v41 = vpop.xlane.xlu0 %861 }
 0x3fd   : > { %v873_v19 = vmax.f32 %v871_v17, %v872_v39  ;;  %v878_v42 = vmax.f32 %v876_v35, %v877_v40  ;;  %v883_v43 = vmax.f32 %v859_v36, %v862_v41  ;;  %v865_v49 = vpop.xlane.xlu1 %864 }
 0x3ff   : > { %v874_v44 = vrot.slane %v873_v19, 1  ;;  %v879_v45 = vrot.slane %v878_v42, 2  ;;  %v884_v46 = vrot.slane %v883_v43, 4 }
 0x400   : > { %v868_v50 = vpop.xlane.xlu0 %867 }
 0x401   : > { %v875_v51 = vmax.f32 %v873_v19, %v874_v44  ;;  %v880_v53 = vmax.f32 %v878_v42, %v879_v45  ;;  %v885_v54 = vmax.f32 %v883_v43, %v884_v46  ;;  %v890_v55 = vmax.f32 %v865_v49, %v868_v50 }
 0x403   : > { %v897_v56 = vmax.f32 %v875_v51, 1e-30  ;;  %v881_v58 = vrot.slane %v880_v53, 1  ;;  %v886_v59 = vrot.slane %v885_v54, 2  ;;  %v891_v60 = vrot.slane %v890_v55, 4 }
 0x405   : > { %1229 = vrcp.f32 %v897_v56  ;;  %v882_v61 = vmax.f32 %v880_v53, %v881_v58  ;;  %v887_v63 = vmax.f32 %v885_v54, %v886_v59  ;;  %v892_v0 = vmax.f32 %v890_v55, %v891_v60 }
 0x407   : > { %v898_v1 = vmax.f32 %v882_v61, 1e-30  ;;  %v888_v3 = vrot.slane %v887_v63, 1  ;;  %v893_v5 = vrot.slane %v892_v0, 2 }
 0x409   : > { %1231 = vrcp.f32 %v898_v1  ;;  %v889_v6 = vmax.f32 %v887_v63, %v888_v3  ;;  %v894_v7 = vmax.f32 %v892_v0, %v893_v5 }
 0x40b   : > { %v899_v8 = vmax.f32 %v889_v6, 1e-30  ;;  %v895_v9 = vrot.slane %v894_v7, 1 }
 0x40d   : > { %1233 = vrcp.f32 %v899_v8  ;;  %v896_v10 = vmax.f32 %v894_v7, %v895_v9 }
 0x40f   : > { %v1230_v12 = vpop.eup %1229  ;;  %v900_v11 = vmax.f32 %v896_v10, 1e-30 }
 0x410   : > { %v909_v20 = vmul.f32 %v1230_v12, %v1493_v48  ;;  %v910_v21 = vmul.f32 %v1230_v12, %v1509_v57 }
 0x411   : > { %1235 = vrcp.f32 %v900_v11 }
 0x412   : > { %vm917_vm2 = vcmp.ne.f32.partialorder %v909_v20, %v909_v20  ;;  %vm918_vm3 = vcmp.ne.f32.partialorder %v910_v21, %v910_v21 }
 0x413   : > { %v1232_v23 = vpop.eup %1231  ;;  %v925_v13 = vsel %vm917_vm2, 0.0, %v909_v20  ;;  %v926_v25 = vsel %vm918_vm3, 0.0, %v910_v21 }
 0x414   : > { %v911_v26 = vmul.f32 %v1232_v23, %v1501_v52  ;;  %v912_v28 = vmul.f32 %v1232_v23, %v1518_v62  ;;  %v933_v29 = vmax.f32 %v925_v13, 0.0  ;;  %v934_v31 = vmax.f32 %v926_v25, 0.0 }
 0x416   : > { %vm919_vm4 = vcmp.ne.f32.partialorder %v911_v26, %v911_v26  ;;  %vm920_vm5 = vcmp.ne.f32.partialorder %v912_v28, %v912_v28  ;;  %v941_v32 = vmin.f32 %v933_v29, 1.0  ;;  %v942_v33 = vmin.f32 %v934_v31, 1.0 }
 0x417   : > { %v1234_v34 = vpop.eup %1233  ;;  %v927_v48 = vsel %vm919_vm4, 0.0, %v911_v26  ;;  %v928_v15 = vsel %vm920_vm5, 0.0, %v912_v28 }
 0x418   : > { %v913_v57 = vmul.f32 %v1234_v34, %v1524_v2  ;;  %v914_v17 = vmul.f32 %v1234_v34, %v1538_v18  ;;  %v935_v35 = vmax.f32 %v927_v48, 0.0  ;;  %v936_v36 = vmax.f32 %v928_v15, 0.0 }
 0x419   : > { %v949_v39 = vmul.f32 %v941_v32, %v1463_v16  ;;  %v950_v52 = vmul.f32 %v942_v33, %v1469_v24 }
 0x41a   : > { %vm921_vm6 = vcmp.ne.f32.partialorder %v913_v57, %v913_v57  ;;  %vm922_vm7 = vcmp.ne.f32.partialorder %v914_v17, %v914_v17  ;;  %v943_v62 = vmin.f32 %v935_v35, 1.0  ;;  %v944_v40 = vmin.f32 %v936_v36, 1.0 }
 0x41b   : > { %v1236_v41 = vpop.eup %1235  ;;  %v929_v19 = vsel %vm921_vm6, 0.0, %v913_v57  ;;  %v930_v42 = vsel %vm922_vm7, 0.0, %v914_v17  ;;  %v957_v43 = vsel %vm302_vm0, %v949_v39, 0.0  ;;  %v958_v44 = vsel %vm302_vm0, %v950_v52, 0.0 }
 0x41c   : > { %v915_v2 = vmul.f32 %v1236_v41, %v1544_v22  ;;  %v916_v18 = vmul.f32 %v1236_v41, %v1553_v27  ;;  %v937_v45 = vmax.f32 %v929_v19, 0.0  ;;  %v938_v46 = vmax.f32 %v930_v42, 0.0 }
 0x41d   : > { %v951_v16 = vmul.f32 %v943_v62, %v1454_v4  ;;  %v952_v24 = vmul.f32 %v944_v40, %v1461_v14  ;;  %v959_v54 = vadd.f32 %v958_v44, %v957_v43 }
 0x41e   : > { %vm923_vm8 = vcmp.ne.f32.partialorder %v915_v2, %v915_v2  ;;  %vm924_vm9 = vcmp.ne.f32.partialorder %v916_v18, %v916_v18  ;;  %v945_v49 = vmin.f32 %v937_v45, 1.0  ;;  %v946_v50 = vmin.f32 %v938_v46, 1.0 }
 0x41f   : > { %v931_v51 = vsel %vm923_vm8, 0.0, %v915_v2  ;;  %v932_v53 = vsel %vm924_vm9, 0.0, %v916_v18  ;;  %v960_v55 = vsel %vm302_vm0, %v951_v16, 0.0  ;;  %v962_v59 = vsel %vm302_vm0, %v952_v24, 0.0 }
 0x420   : > { %v939_v56 = vmax.f32 %v931_v51, 0.0  ;;  %v940_v58 = vmax.f32 %v932_v53, 0.0  ;;  %v953_v22 = vmul.f32 %v945_v49, %v1472_v30  ;;  %v961_v27 = vadd.f32 %v960_v55, %v959_v54 }
 0x421   : > { %v954_v14 = vmul.f32 %v946_v50, %v1479_v38 }
 0x422   : > { %v947_v60 = vmin.f32 %v939_v56, 1.0  ;;  %v948_v4 = vmin.f32 %v940_v58, 1.0  ;;  %v964_v61 = vsel %vm302_vm0, %v953_v22, 0.0  ;;  %v963_v63 = vadd.f32 %v962_v59, %v961_v27 }
 0x423   : > { %v966_v5 = vsel %vm302_vm0, %v954_v14, 0.0 }
 0x424   : > { %v955_v0 = vmul.f32 %v947_v60, %v1477_v37  ;;  %v965_v1 = vadd.f32 %v964_v61, %v963_v63  ;;  %v956_v3 = vmul.f32 %v948_v4, %v1491_v47 }
 0x426   : > { %v968_v30 = vsel %vm302_vm0, %v955_v0, 0.0  ;;  %v967_v6 = vadd.f32 %v966_v5, %v965_v1  ;;  %v970_v8 = vsel %vm302_vm0, %v956_v3, 0.0 }
 0x428   : > { %v969_v7 = vadd.f32 %v968_v30, %v967_v6 }
 0x42a   : > { %v971_v9 = vadd.f32 %v970_v8, %v969_v7 }
 0x42c   : > { %972 = vadd.xlane.f32.xlu1 %v971_v9 }
 0x4b9   : > { %v973_v38 = vpop.xlane.xlu1 %972 }
 0x4ba   : > { %v974_v10 = vrot.slane %v973_v38, 4 }
 0x4bc   : > { %v975_v12 = vadd.f32 %v974_v10, %v973_v38 }
 0x4be   : > { %v976_v11 = vrot.slane %v975_v12, 2 }
 0x4c0   : > { %v977_v37 = vadd.f32 %v976_v11, %v975_v12 }
 0x4c2   : > { %v978_v20 = vrot.slane %v977_v37, 1 }
 0x4c4   : > { %v979_v47 = vadd.f32 %v978_v20, %v977_v37 }
 0x4c6   : > { %1143 = vpush %v979_v47 }
 0x4f7   : > { %s1144_s12 = spop %1143 }
 0x4f8   : > { %v981_v21 = vstv %s1144_s12 }
 0x4f9   : > { %982 = vst [vmem:[%s234_s9] sm:$0xff] %v981_v21 }
 0x4fa   : > { %1250 = shalt.err (!%p1247_p3)
}
 0x4fb   : > { %s1251_s26 = scalar_lea.hbm %s1588_s15, 128  ;;  %s1255_s7 = scalar_lea.hbm %s1633_s5, 256 }
 0x4fc   : > { %p1252_p4 = scmp.ne.s32.totalorder %s1588_s15, %s1251_s26  ;;  %p1256_p9 = scmp.lt.u32.totalorder %s1588_s15, %s1633_s5 }
 0x4fd   : > { %p1257_p10 = scmp.lt.u32.totalorder %s1255_s7, %s1251_s26  ;;  %p1259_p12 = scmp.lt.u32.totalorder %s1251_s26, %s1588_s15 }
 0x4fe   : > { %p1253_p7 = pnand %p1252_p4, %p1372_p5 }
 0x4ff   : > { %p1258_p11 = por %p1257_p10, %p1256_p9 }
 0x500   : > { %p1254_p8 = pneg %p1253_p7 }
 0x501   : > { %p1260_p13 = por %p1259_p12, %p1258_p11 }
 0x503   : > { %p1261_p0 = pnand %p1260_p13, %p1254_p8 }
 0x505   : > { %1264 = shalt.err (!%p1261_p0)
}
 0x506   : > { %1145 = dma.vmem_to_hbm [thread:$0]  (%p1372_p5), %s1583_s10, 128, %s1588_s15, %s984_s16  }
 0x507 PF: > { %p1151_p1 = scmp.ge.s32.totalorder %s1299_s21, 2  ;;  %s1009_s11 = sand.u32 1, %s1287_s18  }
 0x508   : > { %s1010_s12 = scalar_lea.sflag [#allocation3], %s1009_s11 }
 0x509   : > { %p1148_p2 = pnand %p1151_p1, %p1376_p6 }
 0x50b   : > { %1282 = dma.done.wait (!%p1148_p2), %s1010_s12, 128  }
 0x50c   : > { %1284 = vsyncadd (!%p1148_p2), %s1010_s12, 4294967168  ;;  %p15_p3 = scmp.ge.s32.totalorder %s1359_s24, 4   ;;  %s1636_s18 = smov %s1291_s19 }
 0x50d   : > { %s1637_s19 = smov %s1295_s20  ;;  %s1638_s20 = smov %s1370_s27 }
 0x50e   : > { %s1639_s21 = smov %s1359_s24  ;;  %17 = sbr.rel (!%p15_p3) target bundleno = 3 (0x3), region = 78 }
 0x515   :  { %1015 = vsyncpa [#allocation3], 1 }
 0x516   :  { %1017 = vsyncpa [#allocation3 + $0x1], 1 }

</bundles_post_ra>
